<compile_context>
chip_gen: v5e
topology: v5e:2x2
jax: 0.10.0
libtpu: 0.0.40
codegen_flags: <defaults>
</compile_context>

<pallas_src>
import functools

import jax
import jax.numpy as jnp
from jax import lax
from jax.experimental import pallas as pl
from jax.experimental.pallas import tpu as pltpu


def _round_up(x, m):
    return (x + m - 1) // m * m


def _round_down(x, m):
    return x // m * m


def _conv3x3_kernel(x_ref, w_ref, b_ref, o_ref, *, cout):
    """One row-tile: out = im2col_tile @ W + b.

    x_ref: (T, 9*Cin)       bf16  im2col activation tile
    w_ref: (9*Cin, c_pad)   bf16  weight matrix (Cout padded to 128 lanes)
    b_ref: (1, Cout)        f32   bias
    o_ref: (T, Cout)        f32   exact-width output tile
    """
    acc = jnp.dot(x_ref[...], w_ref[...], preferred_element_type=jnp.float32)
    o_ref[...] = (acc[:, :cout] + b_ref[...]).astype(o_ref.dtype)


def _pick_row_tile(n_rows, kc, cout, budget_bytes=24 << 20):
    """Rows per grid step so 2x(in+out) VMEM tiles fit the budget (v7x-safe)."""
    kc_lanes = _round_up(kc, 128)        # VMEM lane padding of the bf16 LHS
    cout_lanes = _round_up(cout, 128)    # VMEM lane padding of the f32 result
    per_row = 2 * (kc_lanes * 2 + cout_lanes * 4)     # double-buffered bytes/row
    t = budget_bytes // per_row
    if n_rows >= 512:
        # Keep >= 2 spatial tiles so v7x's second TensorCore has work at N == 1.
        t = min(t, _round_up(-(-n_rows // 2), 8))
    if t >= n_rows:
        return n_rows                    # single tile: full-dim block is legal
    return max(8, _round_down(t, 8))     # tiled: must be a multiple of 8


def conv3x3_forward(x_nchw, w_oihw, bias, *, use_refl=True):
    """ReflectionPad2d(1) (or ZeroPad2d(1)) + Conv2d(k=3, s=1, bias=True)."""
    N, Cin, H, W = x_nchw.shape
    Cout = w_oihw.shape[0]
    Ho, Wo = H, W                        # k=3, pad=1, stride=1
    Kc = 9 * Cin
    c_pad = _round_up(max(Cout, 1), 128)
    n_rows = Ho * Wo

    # ---- JAX glue: layout only (pad / tap-fold / casts), no FLOPs -----------
    x_nhwc = jnp.transpose(x_nchw, (0, 2, 3, 1)).astype(jnp.bfloat16)
    pad_mode = "reflect" if use_refl else "constant"
    xp = jnp.pad(x_nhwc, ((0, 0), (1, 1), (1, 1), (0, 0)), mode=pad_mode)
    # Fold the 9 conv taps into the contraction dim: (N, Ho, Wo, 9*Cin).
    patches = [xp[:, kh:kh + Ho, kw:kw + Wo, :]
               for kh in range(3) for kw in range(3)]
    xim = jnp.concatenate(patches, axis=-1).reshape(N, n_rows, Kc)

    # Row tiling (no halo thanks to the tap fold); pad rows to a tile multiple.
    t_rows = _pick_row_tile(n_rows, Kc, Cout)
    r_pad = _round_up(n_rows, t_rows)
    if r_pad != n_rows:
        xim = jnp.pad(xim, ((0, 0), (0, r_pad - n_rows), (0, 0)))
    n_tiles = r_pad // t_rows

    # Weight matrix (9*Cin, Cout) matching the patch/channel ordering above,
    # Cout padded to 128 lanes for a canonical MXU result width.
    w_mat = jnp.transpose(w_oihw, (2, 3, 1, 0)).reshape(Kc, Cout)
    w_mat = jnp.pad(w_mat, ((0, 0), (0, c_pad - Cout))).astype(jnp.bfloat16)
    b_row = bias.astype(jnp.float32).reshape(1, Cout)

    # ---- explicit VMEM budget: double-buffered tiles + weights + headroom ---
    kc_lanes = _round_up(Kc, 128)
    need = (2 * t_rows * (kc_lanes * 2 + c_pad * 4)      # in + out/acc tiles
            + 2 * _round_up(Kc, 16) * c_pad * 2          # weights
            + 2 * c_pad * 4)                             # bias
    vmem_limit = int(min(max(need + (8 << 20), 32 << 20), 48 << 20))

    vmem = pltpu.MemorySpace.VMEM
    out = pl.pallas_call(
        functools.partial(_conv3x3_kernel, cout=Cout),
        out_shape=jax.ShapeDtypeStruct((N, r_pad, Cout), jnp.float32),
        grid=(N, n_tiles),
        in_specs=[
            pl.BlockSpec((None, t_rows, Kc), lambda n, t: (n, t, 0),
                         memory_space=vmem),
            pl.BlockSpec((Kc, c_pad), lambda n, t: (0, 0), memory_space=vmem),
            pl.BlockSpec((1, Cout), lambda n, t: (0, 0), memory_space=vmem),
        ],
        out_specs=pl.BlockSpec((None, t_rows, Cout), lambda n, t: (n, t, 0),
                               memory_space=vmem),
        compiler_params=pltpu.CompilerParams(
            dimension_semantics=("parallel", "parallel"),
            vmem_limit_bytes=vmem_limit),
    )(xim, w_mat, b_row)

    # ---- back to NCHW (PyTorch layout) ---------------------------------------
    out = out[:, :n_rows, :].reshape(N, Ho, Wo, Cout)
    return jnp.transpose(out, (0, 3, 1, 2))     # (N, Cout, Ho, Wo)


# --------------------------------------------------------------------------
if __name__ == "__main__":
    key = jax.random.PRNGKey(0)
    kx, kw, kb = jax.random.split(key, 3)

    N, Cin, H, W = 2, 4, 16, 16
    Cout = 8
    x = jax.random.normal(kx, (N, Cin, H, W), jnp.float32)
    fan_in = Cin * 3 * 3
    w = jax.random.normal(kw, (Cout, Cin, 3, 3), jnp.float32) / jnp.sqrt(
        jnp.float32(fan_in))
    b = 0.1 * jax.random.normal(kb, (Cout,), jnp.float32)

    fwd = jax.jit(functools.partial(conv3x3_forward, use_refl=True))
    y = fwd(x, w, b)
    jax.block_until_ready(y)
    assert y.shape == (N, Cout, H, W), y.shape

    # Pure-JAX reference: reflection pad + VALID conv + bias (f32, HIGHEST).
    xp_ref = jnp.pad(x, ((0, 0), (0, 0), (1, 1), (1, 1)), mode="reflect")
    ref = lax.conv_general_dilated(
        xp_ref, w, window_strides=(1, 1), padding="VALID",
        dimension_numbers=("NCHW", "OIHW", "NCHW"),
        precision=lax.Precision.HIGHEST) + b.reshape(1, Cout, 1, 1)
    err = float(jnp.max(jnp.abs(y - ref)))
    assert err < 0.1, f"max abs error vs reference: {err}"

    print("KERNEL_OK")
</pallas_src>

<mosaic_0001>
module attributes {stable_mosaic.version = 11 : i64} {
  func.func @_conv3x3_kernel(%arg0: i32, %arg1: i32, %arg2: memref<1x256x36xbf16, #tpu.memory_space<vmem>>, %arg3: memref<36x128xbf16, #tpu.memory_space<vmem>>, %arg4: memref<1x8xf32, #tpu.memory_space<vmem>>, %arg5: memref<1x256x8xf32, #tpu.memory_space<vmem>>) attributes {dimension_semantics = [#tpu.dimension_semantics<parallel>, #tpu.dimension_semantics<parallel>], iteration_bounds = array<i64: 2, 1>, scalar_prefetch = 0 : i64, scratch_operands = 0 : i64, tpu.core_type = #tpu.core_type<tc>, window_params = [{transform_indices = @transform_0, window_bounds = array<i64: 1, 256, 36>}, {pipeline_mode = #tpu.pipeline_mode<synchronous>, transform_indices = @transform_1, window_bounds = array<i64: 36, 128>}, {pipeline_mode = #tpu.pipeline_mode<synchronous>, transform_indices = @transform_2, window_bounds = array<i64: 1, 8>}, {transform_indices = @transform_3, window_bounds = array<i64: 1, 256, 8>}]} {
    %c0 = arith.constant 0 : index
    %c0_0 = arith.constant 0 : index
    %c0_1 = arith.constant 0 : index
    %0 = vector.load %arg2[%c0, %c0_0, %c0_1] : memref<1x256x36xbf16, #tpu.memory_space<vmem>>, vector<1x256x36xbf16>
    %1 = vector.shape_cast %0 : vector<1x256x36xbf16> to vector<256x36xbf16>
    %c0_2 = arith.constant 0 : index
    %c0_3 = arith.constant 0 : index
    %2 = vector.load %arg3[%c0_2, %c0_3] : memref<36x128xbf16, #tpu.memory_space<vmem>>, vector<36x128xbf16>
    %cst = arith.constant dense<0.000000e+00> : vector<256x128xf32>
    %3 = tpu.matmul %1, %2, %cst {dimension_numbers = #tpu.dot_dimension_numbers<[1], [0], [0], [1], [0, 0, 1, 1], [], []>} : vector<256x36xbf16>, vector<36x128xbf16>, vector<256x128xf32> -> vector<256x128xf32>
    %4 = vector.extract_strided_slice %3 {offsets = [0, 0], sizes = [256, 8], strides = [1, 1]} : vector<256x128xf32> to vector<256x8xf32>
    %c0_4 = arith.constant 0 : index
    %c0_5 = arith.constant 0 : index
    %5 = vector.load %arg4[%c0_4, %c0_5] : memref<1x8xf32, #tpu.memory_space<vmem>>, vector<1x8xf32>
    %6 = vector.broadcast %5 : vector<1x8xf32> to vector<256x8xf32>
    %7 = arith.addf %4, %6 : vector<256x8xf32>
    %c0_6 = arith.constant 0 : index
    %c0_7 = arith.constant 0 : index
    %c0_8 = arith.constant 0 : index
    %8 = vector.load %arg5[%c0_6, %c0_7, %c0_8] : memref<1x256x8xf32, #tpu.memory_space<vmem>>, vector<1x256x8xf32>
    %9 = vector.shape_cast %8 : vector<1x256x8xf32> to vector<256x8xf32>
    %10 = vector.shape_cast %7 : vector<256x8xf32> to vector<1x256x8xf32>
    tpu.vector_store %arg5[%c0_6, %c0_7, %c0_8], %10 {strides = array<i32>} : memref<1x256x8xf32, #tpu.memory_space<vmem>>, vector<1x256x8xf32>,
    return
  }
  func.func @transform_0(%arg0: i32, %arg1: i32) -> (i32, i32, i32) {
    %c0_i32 = arith.constant 0 : i32
    %c0_i32_0 = arith.constant 0 : i32
    return %arg0, %arg1, %c0_i32 : i32, i32, i32
  }
  func.func @transform_1(%arg0: i32, %arg1: i32) -> (i32, i32) {
    %c0_i32 = arith.constant 0 : i32
    %c0_i32_0 = arith.constant 0 : i32
    %c0_i32_1 = arith.constant 0 : i32
    return %c0_i32, %c0_i32_0 : i32, i32
  }
  func.func @transform_2(%arg0: i32, %arg1: i32) -> (i32, i32) {
    %c0_i32 = arith.constant 0 : i32
    %c0_i32_0 = arith.constant 0 : i32
    %c0_i32_1 = arith.constant 0 : i32
    return %c0_i32, %c0_i32_0 : i32, i32
  }
  func.func @transform_3(%arg0: i32, %arg1: i32) -> (i32, i32, i32) {
    %c0_i32 = arith.constant 0 : i32
    %c0_i32_0 = arith.constant 0 : i32
    return %arg0, %arg1, %c0_i32 : i32, i32, i32
  }
}

</mosaic_0001>

<bundles_post_ra>
// kernel: conv3x3_forward.1
= control target key start
LH: loop header
LB: loop body
LE: loop exit
PB: predicated region body
PF: predicated region fallthrough
CT: control target
= control target key end

     0   :  { %s838_s12 = smov 0   ;;  %s840_s13 = smov 0   ;;  %s1021_s0 = inlined_call_operand.vmem [shape: bf16[2,256,36], index: 0, kind: input, shape index: {}]   ;;  %s1022_s1 = inlined_call_operand.vmem [shape: bf16[36,128], index: 1, kind: input, shape index: {}]   ;;  %s1023_s2 = inlined_call_operand.vmem [shape: f32[1,8], index: 2, kind: input, shape index: {}]   ;;  %s1024_s3 = inlined_call_operand.vmem [shape: f32[2,256,8], index: 3, kind: output, shape index: {}]  }
   0x1   :  { %s842_s14 = smov 0  }
   0x2 LB: > { %s25_s15 = sadd.s32 1, %s812_s13  ;;  %p645_p0 = scmp.ge.s32.totalorder %s816_s14, 1  ;;  %s816_s14 = sphi %s842_s14, %s13_s14   ;;  %s812_s13 = sphi %s840_s13, %s1026_s13   ;;  %s808_s12 = sphi %s838_s12, %s1025_s12  }
   0x3   : > { %p27_p1 = scmp.ge.s32.totalorder %s25_s15, 2  ;;  %p158_p2 = scmp.lt.s32.totalorder %s816_s14, 3 }
   0x5   : > { %s1028_s15 = smov (%p27_p1, %s25_s15), 0  ;;  %p159_p3 = pnand %p645_p0, %p158_p2 }
   0x6   : > { %p191_p4 = scmp.lt.s32.totalorder (!%p159_p3), %s808_s12, 1 }
   0x7   : > { %162 = sbr.rel (%p159_p3) target bundleno = 222 (0xde), region = 32 }
   0xc   : > { %v247_v0 = vld [vmem:[%s1022_s1 + $0x10] sm:$0x3]  ;;  %vm392_vm0 = vcmask 1041408   ;;  %s1030_s12 = smov (!%p191_p4, %s808_s12), 1  ;;  %v759_v4 = vld [vmem:[%s1022_s1 + $0x8] sm:$0xff]  ;;  %v758_v5 = vld [vmem:[%s1022_s1] sm:$0xff] }
   0xd   : > { %v337_v1 = vunpack.c.l.b16 %v247_v0  ;;  %s740_s20 = sshll.u32 %s1030_s12, 7  ;;  %vm343_vm1 = vcmask 293888   ;;  %s741_s26 = sshll.u32 %s1030_s12, 8  ;;  %v909_v22 = vld [vmem:[%s1023_s2] ss:$0 sm:$0xff]  ;;  %vm521_vm2 = vcmask 64512  }
   0xe   : > { %s871_s25 = scalar_lea.vmem %s1021_s0, %s740_s20  ;;  %s914_s4 = scalar_lea.vmem %s1024_s3, %s741_s26 }
   0xf   : > { %v340_v2 = vpack.c.b16 %v337_v1, %v337_v1  ;;  %v742_v6 = vld [vmem:[%s871_s25] sm:$0xff]  ;;  %v743_v10 = vld [vmem:[%s871_s25 + $0x8] sm:$0xff]  ;;  %v744_v14 = vld [vmem:[%s871_s25 + $0x10] sm:$0xff] }
  0x10   : > { %v746_v7 = vld [vmem:[%s871_s25 + $0x20] sm:$0xff]  ;;  %v747_v11 = vld [vmem:[%s871_s25 + $0x28] sm:$0xff]  ;;  %v748_v15 = vld [vmem:[%s871_s25 + $0x30] sm:$0xff] }
  0x11   : > { %v394_v3 = vsel %vm392_vm0, %v340_v2, 0  ;;  %v750_v8 = vld [vmem:[%s871_s25 + $0x40] sm:$0xff]  ;;  %v751_v12 = vld [vmem:[%s871_s25 + $0x48] sm:$0xff]  ;;  %v752_v16 = vld [vmem:[%s871_s25 + $0x50] sm:$0xff] }
  0x12   : > { %401 = vmatpush.bf16.msra.mxu0 %v394_v3  ;;  %760 = vmatpush.bf16.msra.mxu1 %v394_v3  ;;  %v754_v9 = vld [vmem:[%s871_s25 + $0x60] sm:$0xff]  ;;  %v755_v13 = vld [vmem:[%s871_s25 + $0x68] sm:$0xff]  ;;  %v756_v17 = vld [vmem:[%s871_s25 + $0x70] sm:$0xff] }
  0x13   : > { %761 = vmatpush.bf16.msra.mxu2 %v394_v3  ;;  %762 = vmatpush.bf16.msra.mxu3 %v394_v3  ;;  %v745_v18 = vld [vmem:[%s871_s25 + $0x18] sm:$0xff] }
  0x14   : > { %v749_v19 = vld [vmem:[%s871_s25 + $0x38] sm:$0xff] }
  0x15   : > { %v753_v20 = vld [vmem:[%s871_s25 + $0x58] sm:$0xff] }
  0x16   : > { %402 = vmatpush.bf16.msra.mxu0 %v759_v4  ;;  %763 = vmatpush.bf16.msra.mxu1 %v759_v4  ;;  %v757_v21 = vld [vmem:[%s871_s25 + $0x78] sm:$0xff] }
  0x17   : > { %764 = vmatpush.bf16.msra.mxu2 %v759_v4  ;;  %765 = vmatpush.bf16.msra.mxu3 %v759_v4 }
  0x1a   : > { %403 = vmatpush.bf16.msra.mxu0 %v758_v5  ;;  %766 = vmatpush.bf16.msra.mxu1 %v758_v5 }
  0x1b   : > { %767 = vmatpush.bf16.msra.mxu2 %v758_v5  ;;  %768 = vmatpush.bf16.msra.mxu3 %v758_v5 }
  0x1d   : > { %722 = vmatmul.msk.bf16.vlgmr.msra.gmra.mxu0 %vm343_vm1, %v742_v6  ;;  %726 = vmatmul.msk.bf16.vlgmr.msra.gmra.mxu1 %vm343_vm1, %v746_v7 }
  0x1e   : > { %730 = vmatmul.msk.bf16.vlgmr.msra.gmra.mxu2 %vm343_vm1, %v750_v8  ;;  %734 = vmatmul.msk.bf16.vlgmr.msra.gmra.mxu3 %vm343_vm1, %v754_v9 }
  0x2d   : > { %723 = vmatmul.msk.bf16.gmra.mxu0 %vm343_vm1, %v743_v10  ;;  %727 = vmatmul.msk.bf16.gmra.mxu1 %vm343_vm1, %v747_v11 }
  0x2e   : > { %731 = vmatmul.msk.bf16.gmra.mxu2 %vm343_vm1, %v751_v12  ;;  %735 = vmatmul.msk.bf16.gmra.mxu3 %vm343_vm1, %v755_v13 }
  0x3d   : > { %724 = vmatmul.msk.bf16.gmra.mxu0 %vm343_vm1, %v744_v14  ;;  %728 = vmatmul.msk.bf16.gmra.mxu1 %vm343_vm1, %v748_v15 }
  0x3e   : > { %732 = vmatmul.msk.bf16.gmra.mxu2 %vm343_vm1, %v752_v16  ;;  %736 = vmatmul.msk.bf16.gmra.mxu3 %vm343_vm1, %v756_v17 }
  0x4d   : > { %725 = vmatmul.msk.bf16.gmra.mxu0 %vm343_vm1, %v745_v18  ;;  %729 = vmatmul.msk.bf16.gmra.mxu1 %vm343_vm1, %v749_v19 }
  0x4e   : > { %733 = vmatmul.msk.bf16.gmra.mxu2 %vm343_vm1, %v753_v20  ;;  %737 = vmatmul.msk.bf16.gmra.mxu3 %vm343_vm1, %v757_v21 }
  0x9a   : > { %v405_v23 = vpop.f32.mrf.mxu0  ;;  %v425_v24 = vpop.f32.mrf.mxu1 }
  0x9b   : > { %v489_v25 = vadd.f32 %v909_v22, %v405_v23  ;;  %v497_v26 = vadd.f32 %v909_v22, %v425_v24 }
  0x9d   : > { %522 = vst.msk [vmem:[%s914_s4] sm:$0xff] %vm521_vm2, %v489_v25 }
  0x9e   : > { %530 = vst.msk [vmem:[%s914_s4 + $0x40] sm:$0xff] %vm521_vm2, %v497_v26 }
  0xa1   : > { %v445_v27 = vpop.f32.mrf.mxu2  ;;  %v465_v28 = vpop.f32.mrf.mxu3 }
  0xa2   : > { %v505_v29 = vadd.f32 %v909_v22, %v445_v27  ;;  %v513_v30 = vadd.f32 %v909_v22, %v465_v28  ;;  %v407_v31 = vpop.f32.mrf.mxu0  ;;  %v427_v32 = vpop.f32.mrf.mxu1 }
  0xa3   : > { %v490_v33 = vadd.f32 %v909_v22, %v407_v31  ;;  %v498_v34 = vadd.f32 %v909_v22, %v427_v32 }
  0xa4   : > { %538 = vst.msk [vmem:[%s914_s4 + $0x80] sm:$0xff] %vm521_vm2, %v505_v29 }
  0xa5   : > { %546 = vst.msk [vmem:[%s914_s4 + $0xc0] sm:$0xff] %vm521_vm2, %v513_v30 }
  0xa6   : > { %523 = vst.msk [vmem:[%s914_s4 + $0x8] sm:$0xff] %vm521_vm2, %v490_v33 }
  0xa7   : > { %531 = vst.msk [vmem:[%s914_s4 + $0x48] sm:$0xff] %vm521_vm2, %v498_v34 }
  0xa9   : > { %v447_v35 = vpop.f32.mrf.mxu2  ;;  %v467_v36 = vpop.f32.mrf.mxu3 }
  0xaa   : > { %v506_v37 = vadd.f32 %v909_v22, %v447_v35  ;;  %v514_v38 = vadd.f32 %v909_v22, %v467_v36  ;;  %v410_v39 = vpop.f32.mrf.mxu0  ;;  %v430_v40 = vpop.f32.mrf.mxu1 }
  0xab   : > { %v491_v41 = vadd.f32 %v909_v22, %v410_v39  ;;  %v499_v42 = vadd.f32 %v909_v22, %v430_v40 }
  0xac   : > { %539 = vst.msk [vmem:[%s914_s4 + $0x88] sm:$0xff] %vm521_vm2, %v506_v37 }
  0xad   : > { %547 = vst.msk [vmem:[%s914_s4 + $0xc8] sm:$0xff] %vm521_vm2, %v514_v38 }
  0xae   : > { %524 = vst.msk [vmem:[%s914_s4 + $0x10] sm:$0xff] %vm521_vm2, %v491_v41 }
  0xaf   : > { %532 = vst.msk [vmem:[%s914_s4 + $0x50] sm:$0xff] %vm521_vm2, %v499_v42 }
  0xb1   : > { %v450_v43 = vpop.f32.mrf.mxu2  ;;  %v470_v44 = vpop.f32.mrf.mxu3 }
  0xb2   : > { %v507_v45 = vadd.f32 %v909_v22, %v450_v43  ;;  %v515_v46 = vadd.f32 %v909_v22, %v470_v44  ;;  %v412_v47 = vpop.f32.mrf.mxu0  ;;  %v432_v48 = vpop.f32.mrf.mxu1 }
  0xb3   : > { %v492_v49 = vadd.f32 %v909_v22, %v412_v47  ;;  %v500_v50 = vadd.f32 %v909_v22, %v432_v48 }
  0xb4   : > { %540 = vst.msk [vmem:[%s914_s4 + $0x90] sm:$0xff] %vm521_vm2, %v507_v45 }
  0xb5   : > { %548 = vst.msk [vmem:[%s914_s4 + $0xd0] sm:$0xff] %vm521_vm2, %v515_v46 }
  0xb6   : > { %525 = vst.msk [vmem:[%s914_s4 + $0x18] sm:$0xff] %vm521_vm2, %v492_v49 }
  0xb7   : > { %533 = vst.msk [vmem:[%s914_s4 + $0x58] sm:$0xff] %vm521_vm2, %v500_v50 }
  0xb9   : > { %v452_v51 = vpop.f32.mrf.mxu2  ;;  %v472_v52 = vpop.f32.mrf.mxu3 }
  0xba   : > { %v508_v53 = vadd.f32 %v909_v22, %v452_v51  ;;  %v516_v54 = vadd.f32 %v909_v22, %v472_v52  ;;  %v415_v55 = vpop.f32.mrf.mxu0  ;;  %v435_v56 = vpop.f32.mrf.mxu1 }
  0xbb   : > { %v493_v57 = vadd.f32 %v909_v22, %v415_v55  ;;  %v501_v58 = vadd.f32 %v909_v22, %v435_v56 }
  0xbc   : > { %541 = vst.msk [vmem:[%s914_s4 + $0x98] sm:$0xff] %vm521_vm2, %v508_v53 }
  0xbd   : > { %549 = vst.msk [vmem:[%s914_s4 + $0xd8] sm:$0xff] %vm521_vm2, %v516_v54 }
  0xbe   : > { %526 = vst.msk [vmem:[%s914_s4 + $0x20] sm:$0xff] %vm521_vm2, %v493_v57 }
  0xbf   : > { %534 = vst.msk [vmem:[%s914_s4 + $0x60] sm:$0xff] %vm521_vm2, %v501_v58 }
  0xc1   : > { %v455_v59 = vpop.f32.mrf.mxu2  ;;  %v475_v60 = vpop.f32.mrf.mxu3 }
  0xc2   : > { %v509_v61 = vadd.f32 %v909_v22, %v455_v59  ;;  %v517_v62 = vadd.f32 %v909_v22, %v475_v60  ;;  %v417_v63 = vpop.f32.mrf.mxu0  ;;  %v437_v0 = vpop.f32.mrf.mxu1 }
  0xc3   : > { %v494_v1 = vadd.f32 %v909_v22, %v417_v63  ;;  %v502_v2 = vadd.f32 %v909_v22, %v437_v0 }
  0xc4   : > { %542 = vst.msk [vmem:[%s914_s4 + $0xa0] sm:$0xff] %vm521_vm2, %v509_v61 }
  0xc5   : > { %550 = vst.msk [vmem:[%s914_s4 + $0xe0] sm:$0xff] %vm521_vm2, %v517_v62 }
  0xc6   : > { %527 = vst.msk [vmem:[%s914_s4 + $0x28] sm:$0xff] %vm521_vm2, %v494_v1 }
  0xc7   : > { %535 = vst.msk [vmem:[%s914_s4 + $0x68] sm:$0xff] %vm521_vm2, %v502_v2 }
  0xc9   : > { %v457_v3 = vpop.f32.mrf.mxu2  ;;  %v477_v4 = vpop.f32.mrf.mxu3 }
  0xca   : > { %v510_v5 = vadd.f32 %v909_v22, %v457_v3  ;;  %v518_v6 = vadd.f32 %v909_v22, %v477_v4  ;;  %v420_v7 = vpop.f32.mrf.mxu0  ;;  %v440_v8 = vpop.f32.mrf.mxu1 }
  0xcb   : > { %v495_v9 = vadd.f32 %v909_v22, %v420_v7  ;;  %v503_v10 = vadd.f32 %v909_v22, %v440_v8 }
  0xcc   : > { %543 = vst.msk [vmem:[%s914_s4 + $0xa8] sm:$0xff] %vm521_vm2, %v510_v5 }
  0xcd   : > { %551 = vst.msk [vmem:[%s914_s4 + $0xe8] sm:$0xff] %vm521_vm2, %v518_v6 }
  0xce   : > { %528 = vst.msk [vmem:[%s914_s4 + $0x30] sm:$0xff] %vm521_vm2, %v495_v9 }
  0xcf   : > { %536 = vst.msk [vmem:[%s914_s4 + $0x70] sm:$0xff] %vm521_vm2, %v503_v10 }
  0xd1   : > { %v460_v11 = vpop.f32.mrf.mxu2  ;;  %v480_v12 = vpop.f32.mrf.mxu3 }
  0xd2   : > { %v511_v13 = vadd.f32 %v909_v22, %v460_v11  ;;  %v519_v14 = vadd.f32 %v909_v22, %v480_v12  ;;  %v422_v15 = vpop.f32.mrf.mxu0  ;;  %v442_v16 = vpop.f32.mrf.mxu1 }
  0xd3   : > { %v496_v17 = vadd.f32 %v909_v22, %v422_v15  ;;  %v504_v18 = vadd.f32 %v909_v22, %v442_v16 }
  0xd4   : > { %544 = vst.msk [vmem:[%s914_s4 + $0xb0] sm:$0xff] %vm521_vm2, %v511_v13 }
  0xd5   : > { %552 = vst.msk [vmem:[%s914_s4 + $0xf0] sm:$0xff] %vm521_vm2, %v519_v14 }
  0xd6   : > { %529 = vst.msk [vmem:[%s914_s4 + $0x38] sm:$0xff] %vm521_vm2, %v496_v17 }
  0xd7   : > { %537 = vst.msk [vmem:[%s914_s4 + $0x78] sm:$0xff] %vm521_vm2, %v504_v18 }
  0xd9   : > { %v462_v19 = vpop.f32.mrf.mxu2  ;;  %v482_v20 = vpop.f32.mrf.mxu3 }
  0xda   : > { %v512_v21 = vadd.f32 %v909_v22, %v462_v19  ;;  %v520_v23 = vadd.f32 %v909_v22, %v482_v20 }
  0xdc   : > { %545 = vst.msk [vmem:[%s914_s4 + $0xb8] sm:$0xff] %vm521_vm2, %v512_v21 }
  0xdd   : > { %553 = vst.msk [vmem:[%s914_s4 + $0xf8] sm:$0xff] %vm521_vm2, %v520_v23 }
  0xde PF: > { %s13_s14 = sadd.s32 1, %s816_s14   ;;  %s1025_s12 = smov %s812_s13 }
  0xdf   : > { %p10_p5 = scmp.ge.s32.totalorder %s13_s14, 4   ;;  %s1026_s13 = smov %s1028_s15 }
  0xe1   :  { %12 = sbr.rel (!%p10_p5) target bundleno = 2 (0x2), region = 62 }

</bundles_post_ra>
